<compile_context>
chip_gen: v7x
topology: tpu7x:2x2x1
jax: 0.10.0
libtpu: 0.0.40
codegen_flags: <defaults>
</compile_context>

<pallas_src>
import math
import functools

import jax
import jax.numpy as jnp
from jax.experimental import pallas as pl
from jax.experimental.pallas import tpu as pltpu


def _round_up(v, m):
    return ((v + m - 1) // m) * m


# ----------------------------------------------------------------------------
# Pallas kernel: fused LayerNorm + Linear on G-packed merged-patch rows.
# ----------------------------------------------------------------------------
def _merge_ln_linear_kernel(x_ref, sel_ref, selt_ref, w_ref, b_ref, o_ref, *,
                            feat, eps):
    # x_ref:    (TM, G*F)  f32 activations (G merged-patch feature vectors / row)
    # sel_ref:  (G*F, Gp)  f32 group selector             (grid-invariant)
    # selt_ref: (Gp, G*F)  f32 group broadcast-back sel.   (grid-invariant)
    # w_ref:    (G*F, G*D) bf16 block-diagonal weight, LN gamma folded in
    # b_ref:    (1,  G*D)  f32 packed bias (beta @ W + b), tiled G times
    # o_ref:    (TM, G*D)  lane-dense output (G*D is a multiple of 128)
    x = x_ref[...].astype(jnp.float32)
    sel = sel_ref[...]
    sel_t = selt_ref[...]
    inv_f = 1.0 / float(feat)

    # Two-pass LayerNorm statistics per F-wide group (numerically robust).
    # Per-group reduce / broadcast is done with tiny selector matmuls so the
    # kernel needs no in-kernel reshape or transpose.
    mean = jnp.dot(x, sel, preferred_element_type=jnp.float32) * inv_f        # (TM, Gp)
    mean_b = jnp.dot(mean, sel_t, preferred_element_type=jnp.float32)         # (TM, G*F)
    xc = x - mean_b
    var = jnp.dot(xc * xc, sel, preferred_element_type=jnp.float32) * inv_f   # (TM, Gp)
    rstd = jax.lax.rsqrt(var + eps)
    rstd_b = jnp.dot(rstd, sel_t, preferred_element_type=jnp.float32)         # (TM, G*F)
    xn = xc * rstd_b          # gamma/beta are folded into w_ref / b_ref

    # Main projection: low-precision operands into the MXU, f32 accumulation.
    y = jnp.dot(xn.astype(w_ref.dtype), w_ref[...],
                preferred_element_type=jnp.float32)                           # (TM, G*D)
    o_ref[...] = (y + b_ref[...]).astype(o_ref.dtype)


def _fused_merge_ln_linear(x_packed, sel, sel_t, w_bd, b_packed, *,
                           feat, out_dtype, block_rows):
    """x_packed: (Rg, G*F) -> (Rg, G*D) fused LayerNorm(F per group) + Linear."""
    rows_g, gf = x_packed.shape
    gd = w_bd.shape[1]
    gp = sel.shape[1]

    # Row tiling: largest tile allowed by block_rows; the partial last block is
    # left to Pallas OOB handling (no row-pad concatenate -> no extra HBM pass).
    sub = 8 if jnp.dtype(x_packed.dtype).itemsize >= 4 else 16
    tm_cap = _round_up(block_rows, sub)
    if rows_g > tm_cap:
        tm = tm_cap
    elif rows_g >= 2 * sub:
        # Keep >= 2 grid steps so ("parallel",) can shard rows across both
        # TensorCores on megacore (v7x-class) parts.
        tm = _round_up(pl.cdiv(rows_g, 2), sub)
    else:
        tm = rows_g               # single full-extent block (always layout-legal)
    grid = (pl.cdiv(rows_g, tm),)

    # VMEM budget: double-buffered x/out tiles + grid-invariant weight/selector
    # blocks + a generous allowance for the f32 LN temporaries.  Clamped so a
    # v7x TensorCore (64 MiB physical VMEM) is never oversubscribed.
    est = (2 * tm * gf * jnp.dtype(x_packed.dtype).itemsize
           + 2 * tm * gd * jnp.dtype(out_dtype).itemsize
           + 2 * gf * gd * jnp.dtype(w_bd.dtype).itemsize
           + (gf * gp + gp * gf + gd) * 4
           + 6 * tm * gf * 4 + 2 * tm * gd * 4)
    vmem_limit = int(min(max(est, 16 * 1024 * 1024), 64 * 1024 * 1024))

    kernel = functools.partial(_merge_ln_linear_kernel, feat=feat, eps=1e-5)
    return pl.pallas_call(
        kernel,
        out_shape=jax.ShapeDtypeStruct((rows_g, gd), out_dtype),
        grid_spec=pltpu.PrefetchScalarGridSpec(
            num_scalar_prefetch=0,
            grid=grid,
            in_specs=[
                # NOTE: sweep pipeline_mode=pl.Buffered(3) on this spec on v7x if
                # tile-boundary DMA shows up as exposed.
                pl.BlockSpec((tm, gf), lambda i: (i, 0)),
                pl.BlockSpec((gf, gp), lambda i: (0, 0)),   # grid-invariant
                pl.BlockSpec((gp, gf), lambda i: (0, 0)),   # grid-invariant
                pl.BlockSpec((gf, gd), lambda i: (0, 0)),   # grid-invariant
                pl.BlockSpec((1, gd), lambda i: (0, 0)),    # grid-invariant
            ],
            out_specs=pl.BlockSpec((tm, gd), lambda i: (i, 0)),
        ),
        compiler_params=pltpu.CompilerParams(
            dimension_semantics=("parallel",),   # row loop shards across TCs
            vmem_limit_bytes=vmem_limit,
        ),
    )(x_packed, sel, sel_t, w_bd, b_packed)


# ----------------------------------------------------------------------------
# PatchMerge / EncoderLayer constructors (one-time weight prep + jit-able fwd).
# ----------------------------------------------------------------------------
def make_patch_merge(params, *, d_model, n_agg, lane_width=128,
                     compute_dtype=jnp.bfloat16, block_rows=512, out_dtype=None):
    """One-time preprocessing of PatchMerge parameters (gamma/beta folded into
    the linear, block-diagonal lane-packed weight, group selectors); returns a
    forward closure ready for jax.jit.  block_rows is the row-tile knob and
    should be tuned per generation (512-1024 on v7x, up to ~2048 on v5e/v6e)."""
    d = d_model
    feat = n_agg * d

    # Lane-dense packing factor: G merged rows per kernel row so the kernel's
    # output tile is G*D lanes wide (a multiple of 128 -> dense vst).
    # NOTE: on v6e/v7x (2x256 MXUs) lane_width=256 is worth sweeping; 128 is the
    # default so v5e (128-wide MXU) is not penalised.
    if d % lane_width == 0:
        g = 1
    elif lane_width % d == 0:
        g = lane_width // d
    else:
        # TODO(synk): general d_model would need feature padding for lane density.
        raise NotImplementedError(
            "d_model must divide lane_width or be a multiple of it")

    w = params["lin_w"].astype(jnp.float32)                          # (F, D) = (in, out)
    wf = params["ln_gamma"].astype(jnp.float32)[:, None] * w         # fold gamma
    bf = params["ln_beta"].astype(jnp.float32) @ w + params["lin_b"].astype(jnp.float32)
    w_bd = jnp.kron(jnp.eye(g, dtype=jnp.float32), wf).astype(compute_dtype)  # (G*F, G*D)
    b_packed = jnp.tile(bf, (g,)).reshape(1, g * d)                   # f32 packed bias

    gp = max(8, g)
    gf = g * feat
    grp = jnp.arange(gf, dtype=jnp.int32) // feat
    sel = (grp[:, None] == jnp.arange(gp, dtype=jnp.int32)[None, :]).astype(jnp.float32)
    sel_t = jnp.asarray(sel.T)

    def forward(x):
        b, e, n, dd = x.shape
        assert dd == d, (dd, d)
        y_dtype = x.dtype if out_dtype is None else out_dtype

        # --- patch tiling / tail padding (exact torch semantics) plus the
        #     lane-packing alignment pad, fused into ONE concatenate.
        if n < n_agg:
            reps = math.ceil(n_agg / n)
            x = jnp.tile(x, (1, 1, reps, 1))[:, :, :n_agg, :]
            tail_pad = 0
            n_cur = n_agg
        else:
            tail_pad = (-n) % n_agg
            n_cur = n + tail_pad
        m = n_cur // n_agg                      # valid merged patches
        m_pad = m
        while (b * e * m_pad) % g != 0:         # lane packing needs rows % g == 0
            m_pad += 1
        extra = (m_pad - m) * n_agg

        pieces = [x]
        if tail_pad:
            pieces.append(x[:, :, x.shape[2] - tail_pad:, :])
        if extra:
            pieces.append(jnp.zeros((b, e, extra, dd), x.dtype))
        if len(pieces) > 1:
            x = jnp.concatenate(pieces, axis=2)

        # torch: cat([x[:,:,i::n_agg,:] for i in range(n_agg)], -1)  ==  reshape.
        # Activations stay in their input dtype (no wrapper-side cast pass); the
        # kernel casts to bf16 only for the projection matmul operands.
        rows_pad = b * e * m_pad
        x_packed = x.reshape(rows_pad // g, gf)

        y = _fused_merge_ln_linear(
            x_packed, sel, sel_t, w_bd, b_packed,
            feat=feat, out_dtype=y_dtype, block_rows=block_rows)

        return y.reshape(b, e, m_pad, d)[:, :, :m, :]

    return forward


def make_encoder_layer(params, *, d_model, n_agg, **kwargs):
    merge = (make_patch_merge(params, d_model=d_model, n_agg=n_agg, **kwargs)
             if n_agg > 1 else None)

    def forward(x):
        if merge is not None:
            x = merge(x)
        # TODO(synk): BAModule forward not available in the provided source; pass-through.
        return x

    return forward


def init_params(key, d_model, n_agg):
    F = n_agg * d_model
    k1, k2, k3, k4 = jax.random.split(key, 4)
    bound = 1.0 / math.sqrt(F)
    return {
        # non-trivial LN affine so the gamma/beta folding is actually exercised
        "ln_gamma": 1.0 + 0.1 * jax.random.normal(k3, (F,), jnp.float32),
        "ln_beta": 0.1 * jax.random.normal(k4, (F,), jnp.float32),
        # stored as (in, out) so the kernel does x @ W directly
        "lin_w": jax.random.uniform(k1, (F, d_model), jnp.float32, -bound, bound),
        "lin_b": jax.random.uniform(k2, (d_model,), jnp.float32, -bound, bound),
    }


def ref_patch_merge(x, params, n_agg, eps=1e-5):
    """Pure-JAX f32 reference with exact PatchMerge.forward semantics."""
    B, E, N, D = x.shape
    if N < n_agg:
        reps = math.ceil(n_agg / N)
        x = jnp.tile(x, (1, 1, reps, 1))[:, :, :n_agg, :]
    else:
        pad = N % n_agg
        if pad != 0:
            pad = n_agg - pad
            x = jnp.concatenate((x, x[:, :, -pad:, :]), axis=-2)
    m = x.shape[2] // n_agg
    xr = x.reshape(B, E, m, n_agg * D)
    mean = xr.mean(-1, keepdims=True)
    var = ((xr - mean) ** 2).mean(-1, keepdims=True)
    xn = (xr - mean) / jnp.sqrt(var + eps)
    xn = xn * params["ln_gamma"] + params["ln_beta"]
    return xn @ params["lin_w"] + params["lin_b"]


if __name__ == "__main__":
    # x is (batch, emb_dim, n_patch, d_model) as in the PyTorch module.
    configs = [
        # (B, E, N,  D, n_agg, block_rows)
        (2, 4, 22, 32, 4, 8),     # tail pad, multi-step grid + partial last row block
        (1, 3, 21, 32, 4, 512),   # tail pad + lane-packing alignment pad
        (2, 2, 3,  32, 4, 512),   # n_patch < n_agg (tile path)
        (2, 4, 64, 32, 4, 512),   # clean divide, >=2 grid steps (megacore split)
    ]

    key = jax.random.PRNGKey(0)
    for (B, E, N, D, n_agg, block_rows) in configs:
        key, kx, kp = jax.random.split(key, 3)
        x = jax.random.normal(kx, (B, E, N, D), jnp.float32)
        params = init_params(kp, D, n_agg)

        fwd = jax.jit(make_encoder_layer(params, d_model=D, n_agg=n_agg,
                                         block_rows=block_rows))
        out = jax.block_until_ready(fwd(x))

        ref = ref_patch_merge(x, params, n_agg)
        assert out.shape == ref.shape, (out.shape, ref.shape)
        # bf16 MXU operands with f32 accumulation + folded gamma/beta -> compare
        # at bf16-appropriate tolerance against the f32 reference.
        max_err = float(jnp.max(jnp.abs(out.astype(jnp.float32) - ref)))
        assert max_err < 5e-2, (B, E, N, D, n_agg, max_err)

    print("KERNEL_OK")
</pallas_src>

<mosaic_0001>
module attributes {stable_mosaic.version = 11 : i64} {
  func.func @_merge_ln_linear_kernel(%arg0: i32, %arg1: memref<8x512xf32, #tpu.memory_space<vmem>>, %arg2: memref<512x8xf32, #tpu.memory_space<vmem>>, %arg3: memref<8x512xf32, #tpu.memory_space<vmem>>, %arg4: memref<512x128xbf16, #tpu.memory_space<vmem>>, %arg5: memref<1x128xf32, #tpu.memory_space<vmem>>, %arg6: memref<8x128xf32, #tpu.memory_space<vmem>>) attributes {dimension_semantics = [#tpu.dimension_semantics<parallel>], iteration_bounds = array<i64: 2>, scalar_prefetch = 0 : i64, scratch_operands = 0 : i64, tpu.core_type = #tpu.core_type<tc>, window_params = [{transform_indices = @transform_0, window_bounds = array<i64: 8, 512>}, {pipeline_mode = #tpu.pipeline_mode<synchronous>, transform_indices = @transform_1, window_bounds = array<i64: 512, 8>}, {pipeline_mode = #tpu.pipeline_mode<synchronous>, transform_indices = @transform_2, window_bounds = array<i64: 8, 512>}, {pipeline_mode = #tpu.pipeline_mode<synchronous>, transform_indices = @transform_3, window_bounds = array<i64: 512, 128>}, {pipeline_mode = #tpu.pipeline_mode<synchronous>, transform_indices = @transform_4, window_bounds = array<i64: 1, 128>}, {transform_indices = @transform_5, window_bounds = array<i64: 8, 128>}]} {
    %c0 = arith.constant 0 : index
    %c0_0 = arith.constant 0 : index
    %0 = vector.load %arg1[%c0, %c0_0] : memref<8x512xf32, #tpu.memory_space<vmem>>, vector<8x512xf32>
    %c0_1 = arith.constant 0 : index
    %c0_2 = arith.constant 0 : index
    %1 = vector.load %arg2[%c0_1, %c0_2] : memref<512x8xf32, #tpu.memory_space<vmem>>, vector<512x8xf32>
    %c0_3 = arith.constant 0 : index
    %c0_4 = arith.constant 0 : index
    %2 = vector.load %arg3[%c0_3, %c0_4] : memref<8x512xf32, #tpu.memory_space<vmem>>, vector<8x512xf32>
    %cst = arith.constant dense<0.000000e+00> : vector<8x8xf32>
    %3 = tpu.matmul %0, %1, %cst {dimension_numbers = #tpu.dot_dimension_numbers<[1], [0], [0], [1], [0, 0, 1, 1], [], []>} : vector<8x512xf32>, vector<512x8xf32>, vector<8x8xf32> -> vector<8x8xf32>
    %cst_5 = arith.constant 7.812500e-03 : f32
    %4 = vector.broadcast %cst_5 : f32 to vector<8x8xf32>
    %5 = arith.mulf %3, %4 : vector<8x8xf32>
    %cst_6 = arith.constant dense<0.000000e+00> : vector<8x512xf32>
    %6 = tpu.matmul %5, %2, %cst_6 {dimension_numbers = #tpu.dot_dimension_numbers<[1], [0], [0], [1], [0, 0, 1, 1], [], []>} : vector<8x8xf32>, vector<8x512xf32>, vector<8x512xf32> -> vector<8x512xf32>
    %7 = arith.subf %0, %6 : vector<8x512xf32>
    %8 = arith.mulf %7, %7 : vector<8x512xf32>
    %cst_7 = arith.constant dense<0.000000e+00> : vector<8x8xf32>
    %9 = tpu.matmul %8, %1, %cst_7 {dimension_numbers = #tpu.dot_dimension_numbers<[1], [0], [0], [1], [0, 0, 1, 1], [], []>} : vector<8x512xf32>, vector<512x8xf32>, vector<8x8xf32> -> vector<8x8xf32>
    %cst_8 = arith.constant 7.812500e-03 : f32
    %10 = vector.broadcast %cst_8 : f32 to vector<8x8xf32>
    %11 = arith.mulf %9, %10 : vector<8x8xf32>
    %cst_9 = arith.constant 9.99999974E-6 : f32
    %12 = vector.broadcast %cst_9 : f32 to vector<8x8xf32>
    %13 = arith.addf %11, %12 : vector<8x8xf32>
    %14 = math.rsqrt %13 : vector<8x8xf32>
    %cst_10 = arith.constant dense<0.000000e+00> : vector<8x512xf32>
    %15 = tpu.matmul %14, %2, %cst_10 {dimension_numbers = #tpu.dot_dimension_numbers<[1], [0], [0], [1], [0, 0, 1, 1], [], []>} : vector<8x8xf32>, vector<8x512xf32>, vector<8x512xf32> -> vector<8x512xf32>
    %16 = arith.mulf %7, %15 : vector<8x512xf32>
    %17 = arith.truncf %16 : vector<8x512xf32> to vector<8x512xbf16>
    %c0_11 = arith.constant 0 : index
    %c0_12 = arith.constant 0 : index
    %18 = vector.load %arg4[%c0_11, %c0_12] : memref<512x128xbf16, #tpu.memory_space<vmem>>, vector<512x128xbf16>
    %cst_13 = arith.constant dense<0.000000e+00> : vector<8x128xf32>
    %19 = tpu.matmul %17, %18, %cst_13 {dimension_numbers = #tpu.dot_dimension_numbers<[1], [0], [0], [1], [0, 0, 1, 1], [], []>} : vector<8x512xbf16>, vector<512x128xbf16>, vector<8x128xf32> -> vector<8x128xf32>
    %c0_14 = arith.constant 0 : index
    %c0_15 = arith.constant 0 : index
    %20 = vector.load %arg5[%c0_14, %c0_15] : memref<1x128xf32, #tpu.memory_space<vmem>>, vector<1x128xf32>
    %21 = vector.broadcast %20 : vector<1x128xf32> to vector<8x128xf32>
    %22 = arith.addf %19, %21 : vector<8x128xf32>
    %c0_16 = arith.constant 0 : index
    %c0_17 = arith.constant 0 : index
    %23 = vector.load %arg6[%c0_16, %c0_17] : memref<8x128xf32, #tpu.memory_space<vmem>>, vector<8x128xf32>
    tpu.vector_store %arg6[%c0_16, %c0_17], %22 {strides = array<i32>} : memref<8x128xf32, #tpu.memory_space<vmem>>, vector<8x128xf32>,
    return
  }
  func.func @transform_0(%arg0: i32) -> (i32, i32) {
    %c0_i32 = arith.constant 0 : i32
    %c0_i32_0 = arith.constant 0 : i32
    return %arg0, %c0_i32 : i32, i32
  }
  func.func @transform_1(%arg0: i32) -> (i32, i32) {
    %c0_i32 = arith.constant 0 : i32
    %c0_i32_0 = arith.constant 0 : i32
    %c0_i32_1 = arith.constant 0 : i32
    return %c0_i32, %c0_i32_0 : i32, i32
  }
  func.func @transform_2(%arg0: i32) -> (i32, i32) {
    %c0_i32 = arith.constant 0 : i32
    %c0_i32_0 = arith.constant 0 : i32
    %c0_i32_1 = arith.constant 0 : i32
    return %c0_i32, %c0_i32_0 : i32, i32
  }
  func.func @transform_3(%arg0: i32) -> (i32, i32) {
    %c0_i32 = arith.constant 0 : i32
    %c0_i32_0 = arith.constant 0 : i32
    %c0_i32_1 = arith.constant 0 : i32
    return %c0_i32, %c0_i32_0 : i32, i32
  }
  func.func @transform_4(%arg0: i32) -> (i32, i32) {
    %c0_i32 = arith.constant 0 : i32
    %c0_i32_0 = arith.constant 0 : i32
    %c0_i32_1 = arith.constant 0 : i32
    return %c0_i32, %c0_i32_0 : i32, i32
  }
  func.func @transform_5(%arg0: i32) -> (i32, i32) {
    %c0_i32 = arith.constant 0 : i32
    %c0_i32_0 = arith.constant 0 : i32
    return %arg0, %c0_i32 : i32, i32
  }
}

</mosaic_0001>

<bundles_post_ra>
// kernel: forward.1
= control target key start
LH: loop header
LB: loop body
LE: loop exit
PB: predicated region body
PF: predicated region fallthrough
CT: control target
= control target key end

     0   :  { %s1726_s18 = smov 0   ;;  %s2238_s0 = inlined_call_operand.vmem [shape: f32[12,512], index: 0, kind: input, shape index: {}]   ;;  %s2239_s1 = inlined_call_operand.vmem [shape: f32[512,8], index: 1, kind: input, shape index: {}]   ;;  %s2240_s2 = inlined_call_operand.vmem [shape: f32[8,512], index: 2, kind: input, shape index: {}]   ;;  %s2241_s3 = inlined_call_operand.vmem [shape: bf16[512,128], index: 3, kind: input, shape index: {}]   ;;  %s2242_s4 = inlined_call_operand.vmem [shape: f32[1,128], index: 4, kind: input, shape index: {}]   ;;  %s2243_s5 = inlined_call_operand.vmem [shape: f32[12,128], index: 5, kind: output, shape index: {}]  }
   0x1 LB: > { %s1284_s19 = sadd.s32 4294967295, %s1693_s18   ;;  %p1288_p0 = scmp.ge.s32.totalorder %s1693_s18, 1  ;;  %s1693_s18 = sphi %s1726_s18, %s15_s18  }
   0x2   : > { %p187_p1 = scmp.lt.s32.totalorder %s1693_s18, 3 }
   0x4   : > { %p188_p2 = pnand %p1288_p0, %p187_p1 }
   0x5   : > { %v244_v0 = vld [vmem:[%s2239_s1 + $0x80] sm:$0xff] (!%p188_p2)  ;;  %v245_v1 = vld [vmem:[%s2239_s1 + $0x88] sm:$0xff] (!%p188_p2)  ;;  %v246_v11 = vld [vmem:[%s2239_s1 + $0x90] sm:$0xff] (!%p188_p2)  ;;  %p1834_p3 = scmp.lt.s32.totalorder (!%p188_p2), %s1284_s19, 1  ;;  %vm437_vm0 = vcmask (!%p188_p2), 64512  }
   0x6   : > { %191 = sbr.rel (%p188_p2) target bundleno = 1149 (0x47d), region = 40  ;;  %v276_v2 = vld [vmem:[%s2239_s1 + $0x180] sm:$0xff] (!%p188_p2)  ;;  %v1743_v3 = vpack.c.bf16 (!%p188_p2), %v245_v1, %v244_v0  ;;  %v277_v4 = vld [vmem:[%s2239_s1 + $0x188] sm:$0xff] (!%p188_p2)  ;;  %v247_v13 = vld [vmem:[%s2239_s1 + $0x98] sm:$0xff] (!%p188_p2) }
   0x7   : > { %v228_v5 = vld [vmem:[%s2239_s1] sm:$0xff] (!%p188_p2)  ;;  %v229_v6 = vld [vmem:[%s2239_s1 + $0x8] sm:$0xff] (!%p188_p2)  ;;  %v1754_v7 = vpack.c.bf16 (!%p188_p2), %v277_v4, %v276_v2  ;;  %v278_v14 = vld [vmem:[%s2239_s1 + $0x190] sm:$0xff] (!%p188_p2)  ;;  %v1781_v16 = vpack.c.bf16 (!%p188_p2), %v247_v13, %v246_v11 }
   0x8   : > { %v1756_v8 = vpack.c.bf16 (!%p188_p2), %v229_v6, %v228_v5  ;;  %v260_v9 = vld [vmem:[%s2239_s1 + $0x100] sm:$0xff] (!%p188_p2)  ;;  %v261_v10 = vld [vmem:[%s2239_s1 + $0x108] sm:$0xff] (!%p188_p2)  ;;  %1517 = vmatprep.subr.bf16.mxu0 (!%p188_p2), %v1743_v3  ;;  %v279_v15 = vld [vmem:[%s2239_s1 + $0x198] sm:$0xff] (!%p188_p2) }
   0x9   : > { %v1768_v12 = vpack.c.bf16 (!%p188_p2), %v261_v10, %v260_v9  ;;  %1549 = vmatprep.subr.bf16.mxu1 (!%p188_p2), %v1754_v7  ;;  %v1783_v17 = vpack.c.bf16 (!%p188_p2), %v279_v15, %v278_v14  ;;  %v230_v18 = vld [vmem:[%s2239_s1 + $0x10] sm:$0xff] (!%p188_p2)  ;;  %v231_v19 = vld [vmem:[%s2239_s1 + $0x18] sm:$0xff] (!%p188_p2)  ;;  %v248_v23 = vld [vmem:[%s2239_s1 + $0xa0] sm:$0xff] (!%p188_p2) }
   0xa   : > { %1519 = vmatpush3.bf16.msra.mxu0 (!%p188_p2), %v1756_v8  ;;  %v262_v20 = vld [vmem:[%s2239_s1 + $0x110] sm:$0xff] (!%p188_p2)  ;;  %v1795_v21 = vpack.c.bf16 (!%p188_p2), %v231_v19, %v230_v18  ;;  %v263_v22 = vld [vmem:[%s2239_s1 + $0x118] sm:$0xff] (!%p188_p2)  ;;  %v249_v24 = vld [vmem:[%s2239_s1 + $0xa8] sm:$0xff] (!%p188_p2) }
   0xb   : > { %1551 = vmatpush3.bf16.msra.mxu1 (!%p188_p2), %v1768_v12  ;;  %1521 = vmatprep.subr.bf16.mxu0 (!%p188_p2), %v1781_v16  ;;  %v1808_v25 = vpack.c.bf16 (!%p188_p2), %v263_v22, %v262_v20  ;;  %v1810_v26 = vpack.c.bf16 (!%p188_p2), %v249_v24, %v248_v23  ;;  %v280_v27 = vld [vmem:[%s2239_s1 + $0x1a0] sm:$0xff] (!%p188_p2)  ;;  %v281_v28 = vld [vmem:[%s2239_s1 + $0x1a8] sm:$0xff] (!%p188_p2)  ;;  %v250_v35 = vld [vmem:[%s2239_s1 + $0xb0] sm:$0xff] (!%p188_p2) }
   0xc   : > { %1553 = vmatprep.subr.bf16.mxu1 (!%p188_p2), %v1783_v17  ;;  %v232_v29 = vld [vmem:[%s2239_s1 + $0x20] sm:$0xff] (!%p188_p2)  ;;  %v1821_v30 = vpack.c.bf16 (!%p188_p2), %v281_v28, %v280_v27  ;;  %v233_v31 = vld [vmem:[%s2239_s1 + $0x28] sm:$0xff] (!%p188_p2)  ;;  %v251_v36 = vld [vmem:[%s2239_s1 + $0xb8] sm:$0xff] (!%p188_p2) }
   0xd   : > { %v264_v32 = vld [vmem:[%s2239_s1 + $0x120] sm:$0xff]  ;;  %v265_v33 = vld [vmem:[%s2239_s1 + $0x128] sm:$0xff]  ;;  %v1839_v34 = vpack.c.bf16 %v233_v31, %v232_v29  ;;  %v282_v37 = vld [vmem:[%s2239_s1 + $0x1b0] sm:$0xff]  ;;  %v1854_v39 = vpack.c.bf16 %v251_v36, %v250_v35  ;;  %s2246_s19 = smov (!%p1834_p3, %s1284_s19), 1 }
   0xe   : > { %1523 = vmatpush3.bf16.msra.mxu0 %v1795_v21  ;;  %v1852_v38 = vpack.c.bf16 %v265_v33, %v264_v32  ;;  %v283_v40 = vld [vmem:[%s2239_s1 + $0x1b8] sm:$0xff]  ;;  %v234_v41 = vld [vmem:[%s2239_s1 + $0x30] sm:$0xff]  ;;  %v252_v46 = vld [vmem:[%s2239_s1 + $0xc0] sm:$0xff]  ;;  %s1331_s15 = sshll.u32 %s2246_s19, 5  ;;  %s1291_s21 = sshll.u32 %s2246_s19, 3 }
   0xf   : > { %1555 = vmatpush3.bf16.msra.mxu1 %v1808_v25  ;;  %1525 = vmatprep.subr.bf16.mxu0 %v1810_v26  ;;  %v235_v42 = vld [vmem:[%s2239_s1 + $0x38] sm:$0xff]  ;;  %v1866_v43 = vpack.c.bf16 %v283_v40, %v282_v37  ;;  %v266_v44 = vld [vmem:[%s2239_s1 + $0x130] sm:$0xff]  ;;  %v253_v47 = vld [vmem:[%s2239_s1 + $0xc8] sm:$0xff]  ;;  %s1965_s9 = scalar_lea.vmem %s2238_s0, %s1331_s15  ;;  %s222_s24 = scalar_lea.vmem %s2243_s5, %s1291_s21 }
  0x10   : > { %1557 = vmatprep.subr.bf16.mxu1 %v1821_v30  ;;  %v267_v45 = vld [vmem:[%s2239_s1 + $0x138] sm:$0xff]  ;;  %v284_v48 = vld [vmem:[%s2239_s1 + $0x1c0] sm:$0xff]  ;;  %v285_v49 = vld [vmem:[%s2239_s1 + $0x1c8] sm:$0xff]  ;;  %v1893_v50 = vpack.c.bf16 %v235_v42, %v234_v41  ;;  %v1899_v52 = vpack.c.bf16 %v253_v47, %v252_v46 }
  0x11   : > { %v1897_v51 = vpack.c.bf16 %v267_v45, %v266_v44  ;;  %v236_v53 = vld [vmem:[%s2239_s1 + $0x40] sm:$0xff]  ;;  %v237_v54 = vld [vmem:[%s2239_s1 + $0x48] sm:$0xff]  ;;  %v1911_v56 = vpack.c.bf16 %v285_v49, %v284_v48  ;;  %v254_v58 = vld [vmem:[%s2239_s1 + $0xd0] sm:$0xff] }
  0x12   : > { %1527 = vmatpush3.bf16.msra.mxu0 %v1839_v34  ;;  %v268_v55 = vld [vmem:[%s2239_s1 + $0x140] sm:$0xff]  ;;  %v269_v57 = vld [vmem:[%s2239_s1 + $0x148] sm:$0xff]  ;;  %v255_v59 = vld [vmem:[%s2239_s1 + $0xd8] sm:$0xff]  ;;  %v1930_v62 = vpack.c.bf16 %v237_v54, %v236_v53 }
  0x13   : > { %1559 = vmatpush3.bf16.msra.mxu1 %v1852_v38  ;;  %1529 = vmatprep.subr.bf16.mxu0 %v1854_v39  ;;  %v286_v60 = vld [vmem:[%s2239_s1 + $0x1d0] sm:$0xff]  ;;  %v287_v61 = vld [vmem:[%s2239_s1 + $0x1d8] sm:$0xff]  ;;  %v1937_v0 = vpack.c.bf16 %v269_v57, %v268_v55  ;;  %v1939_v1 = vpack.c.bf16 %v255_v59, %v254_v58  ;;  %v256_v9 = vld [vmem:[%s2239_s1 + $0xe0] sm:$0xff]  ;;  %v1695_v58 = vmov 0.0  }
  0x14   : > { %1561 = vmatprep.subr.bf16.mxu1 %v1866_v43  ;;  %v238_v63 = vld [vmem:[%s2239_s1 + $0x50] sm:$0xff]  ;;  %v239_v2 = vld [vmem:[%s2239_s1 + $0x58] sm:$0xff]  ;;  %v1951_v6 = vpack.c.bf16 %v287_v61, %v286_v60  ;;  %v257_v10 = vld [vmem:[%s2239_s1 + $0xe8] sm:$0xff] }
  0x15   : > { %v270_v4 = vld [vmem:[%s2239_s1 + $0x150] sm:$0xff]  ;;  %v271_v5 = vld [vmem:[%s2239_s1 + $0x158] sm:$0xff]  ;;  %v288_v11 = vld [vmem:[%s2239_s1 + $0x1e0] sm:$0xff]  ;;  %v1977_v18 = vpack.c.bf16 %v239_v2, %v238_v63  ;;  %v1992_v24 = vpack.c.bf16 %v257_v10, %v256_v9 }
  0x16   : > { %1531 = vmatpush3.bf16.msra.mxu0 %v1893_v50  ;;  %v289_v13 = vld [vmem:[%s2239_s1 + $0x1e8] sm:$0xff]  ;;  %v240_v14 = vld [vmem:[%s2239_s1 + $0x60] sm:$0xff]  ;;  %v258_v22 = vld [vmem:[%s2239_s1 + $0xf0] sm:$0xff]  ;;  %v1990_v23 = vpack.c.bf16 %v271_v5, %v270_v4 }
  0x17   : > { %1563 = vmatpush3.bf16.msra.mxu1 %v1897_v51  ;;  %1533 = vmatprep.subr.bf16.mxu0 %v1899_v52  ;;  %v241_v15 = vld [vmem:[%s2239_s1 + $0x68] sm:$0xff]  ;;  %v272_v19 = vld [vmem:[%s2239_s1 + $0x160] sm:$0xff]  ;;  %v259_v27 = vld [vmem:[%s2239_s1 + $0xf8] sm:$0xff]  ;;  %v2004_v31 = vpack.c.bf16 %v289_v13, %v288_v11 }
  0x18   : > { %1565 = vmatprep.subr.bf16.mxu1 %v1911_v56  ;;  %v273_v20 = vld [vmem:[%s2239_s1 + $0x168] sm:$0xff]  ;;  %v2001_v29 = vld [vmem:[%s1965_s9 + $0x18] sm:$0xff]  ;;  %v290_v32 = vld [vmem:[%s2239_s1 + $0x1f0] sm:$0xff]  ;;  %v2021_v37 = vpack.c.bf16 %v241_v15, %v240_v14  ;;  %v2033_v44 = vpack.c.bf16 %v259_v27, %v258_v22 }
  0x19   : > { %v1998_v28 = vld [vmem:[%s1965_s9 + $0x8] sm:$0xff]  ;;  %v291_v33 = vld [vmem:[%s2239_s1 + $0x1f8] sm:$0xff]  ;;  %v242_v35 = vld [vmem:[%s2239_s1 + $0x70] sm:$0xff]  ;;  %430 = vmatprep.mubr.f32.mxu1 %v2001_v29  ;;  %v2031_v42 = vpack.c.bf16 %v273_v20, %v272_v19 }
  0x1a   : > { %1535 = vmatpush3.bf16.msra.mxu0 %v1930_v62  ;;  %360 = vmatprep.mubr.f32.mxu0 %v1998_v28  ;;  %v243_v36 = vld [vmem:[%s2239_s1 + $0x78] sm:$0xff]  ;;  %v274_v40 = vld [vmem:[%s2239_s1 + $0x170] sm:$0xff]  ;;  %v2036_v45 = vpack.c.bf16 %v291_v33, %v290_v32  ;;  %v2043_v48 = vld [vmem:[%s1965_s9] sm:$0xff] }
  0x1b   : > { %1567 = vmatpush3.bf16.msra.mxu1 %v1937_v0  ;;  %1537 = vmatprep.subr.bf16.mxu0 %v1939_v1  ;;  %v275_v41 = vld [vmem:[%s2239_s1 + $0x178] sm:$0xff]  ;;  %v1546_v46 = vpack.c.bf16 %v243_v36, %v242_v35  ;;  %v2046_v49 = vld [vmem:[%s1965_s9 + $0x10] sm:$0xff]  ;;  %v293_v53 = vld [vmem:[%s2240_s2 + $0x8] sm:$0xff] }
  0x1c   : > { %1569 = vmatprep.subr.bf16.mxu1 %v1951_v6  ;;  %v1578_v47 = vpack.c.bf16 %v275_v41, %v274_v40  ;;  %v295_v54 = vld [vmem:[%s2240_s2 + $0x18] sm:$0xff]  ;;  %v2059_v55 = vld [vmem:[%s2240_s2] sm:$0xff]  ;;  %v2064_v57 = vld [vmem:[%s2240_s2 + $0x10] sm:$0xff] }
  0x1d   : > { %v1655_v11 = vld [vmem:[%s2241_s3] sm:$0xff]   ;;  %v1657_v14 = vld [vmem:[%s2241_s3 + $0x48] sm:$0xff]   ;;  %v1661_v22 = vld [vmem:[%s2241_s3 + $0x50] sm:$0xff]  }
  0x1e   : > { %1539 = vmatpush3.bf16.msra.mxu0 %v1977_v18  ;;  %v1656_v13 = vld [vmem:[%s2241_s3 + $0x80] sm:$0xff]   ;;  %v1658_v15 = vld [vmem:[%s2241_s3 + $0xc8] sm:$0xff]   ;;  %v1664_v27 = vld [vmem:[%s2241_s3 + $0x90] sm:$0xff]  }
  0x1f   : > { %1571 = vmatpush3.bf16.msra.mxu1 %v1990_v23  ;;  %1541 = vmatprep.subr.bf16.mxu0 %v1992_v24  ;;  %v1659_v19 = vld [vmem:[%s2241_s3 + $0x8] sm:$0xff]   ;;  %v1668_v32 = vld [vmem:[%s2241_s3 + $0x98] sm:$0xff]   ;;  %v1669_v33 = vld [vmem:[%s2241_s3 + $0x60] sm:$0xff]  }
  0x20   : > { %1573 = vmatprep.subr.bf16.mxu1 %v2004_v31  ;;  %v1660_v20 = vld [vmem:[%s2241_s3 + $0x88] sm:$0xff]   ;;  %v1670_v35 = vld [vmem:[%s2241_s3 + $0xe0] sm:$0xff]  }
  0x21   : > { %v1671_v36 = vld [vmem:[%s2241_s3 + $0x20] sm:$0xff]   ;;  %v1673_v40 = vld [vmem:[%s2241_s3 + $0x68] sm:$0xff]  }
  0x22   : > { %1543 = vmatpush3.bf16.msra.mxu0 %v2021_v37  ;;  %v1674_v41 = vld [vmem:[%s2241_s3 + $0xe8] sm:$0xff]  }
  0x23   : > { %1575 = vmatpush3.bf16.msra.mxu1 %v2031_v42  ;;  %1545 = vmatprep.subr.bf16.mxu0 %v2033_v44 }
  0x24   : > { %1577 = vmatprep.subr.bf16.mxu1 %v2036_v45 }
  0x26   : > { %1547 = vmatpush3.bf16.msra.mxu0 %v1546_v46 }
  0x27   : > { %1579 = vmatpush3.bf16.msra.mxu1 %v1578_v47  ;;  %441 = vmatprep.subr.mxu0 %v293_v53 }
  0x28   : > { %512 = vmatprep.subr.mxu1 %v295_v54 }
  0x29   : > { %361 = vmatmul.mubr.f32.vlgmr.msra.gmra.mrb[0].mxu0 %v2043_v48 }
  0x2a   : > { %431 = vmatmul.mubr.f32.vlgmr.msra.gmra.mrb[0].mxu1 %v2046_v49  ;;  %442 = vmatpush1.msra.mxu0 %v2059_v55 }
  0x2b   : > { %513 = vmatpush1.msra.mxu1 %v2064_v57  ;;  %505 = vmatprep.mubr.f32.mxu0 %v1695_v58 }
  0x2c   : > { %576 = vmatprep.mubr.f32.mxu1 %v1695_v58  ;;  %1581 = vmatprep.subr.bf16.mxu0 %v1743_v3 }
  0x2d   : > { %1613 = vmatprep.subr.bf16.mxu1 %v1754_v7 }
  0xfc   : > { %v1364_v59 = vpop.f32.mrb[0].mxu0 }
  0xfd   : > { %v1399_v60 = vpop.f32.mrb[0].mxu1  ;;  %v1365_v61 = vpop.f32.mrb[1].mxu0 }
  0xfe   : > { %v1366_v63 = vadd.f32 %v1365_v61, %v1364_v59  ;;  %v1400_v2 = vpop.f32.mrb[1].mxu1 }
  0xff   : > { %v1401_v4 = vadd.f32 %v1400_v2, %v1399_v60 }
 0x101   : > { %v433_v5 = vadd.f32 %v1401_v4, %v1366_v63 }
 0x103   : > { %v436_v9 = vmul.f32 0.0078125, %v433_v5 }
 0x105   : > { %1292 = vmatmul.mubr.msk.f32.vlgmr.msra.gmra.mrb[2].mxu0 %vm437_vm0, %v436_v9  ;;  %1293 = vmatmul.mubr.msk.f32.vlgmr.msra.gmra.mrb[2].mxu1 %vm437_vm0, %v436_v9 }
 0x106   : > { %1583 = vmatpush3.bf16.msra.mxu0 %v1756_v8  ;;  %1615 = vmatpush3.bf16.msra.mxu1 %v1768_v12 }
 0x107   : > { %1585 = vmatprep.subr.bf16.mxu0 %v1781_v16  ;;  %1617 = vmatprep.subr.bf16.mxu1 %v1783_v17 }
 0x10a   : > { %1587 = vmatpush3.bf16.msra.mxu0 %v1795_v21  ;;  %1619 = vmatpush3.bf16.msra.mxu1 %v1808_v25 }
 0x10b   : > { %1589 = vmatprep.subr.bf16.mxu0 %v1810_v26  ;;  %1621 = vmatprep.subr.bf16.mxu1 %v1821_v30 }
 0x10e   : > { %1591 = vmatpush3.bf16.msra.mxu0 %v1839_v34  ;;  %1623 = vmatpush3.bf16.msra.mxu1 %v1852_v38 }
 0x10f   : > { %1593 = vmatprep.subr.bf16.mxu0 %v1854_v39  ;;  %1625 = vmatprep.subr.bf16.mxu1 %v1866_v43  ;;  %v1653_v39 = vld [vmem:[%s2241_s3 + $0x40] sm:$0xff]  }
 0x110   : > { %v1654_v43 = vld [vmem:[%s2241_s3 + $0xc0] sm:$0xff]  }
 0x112   : > { %1595 = vmatpush3.bf16.msra.mxu0 %v1893_v50  ;;  %1627 = vmatpush3.bf16.msra.mxu1 %v1897_v51 }
 0x113   : > { %1597 = vmatprep.subr.bf16.mxu0 %v1899_v52  ;;  %1629 = vmatprep.subr.bf16.mxu1 %v1911_v56 }
 0x116   : > { %1599 = vmatpush3.bf16.msra.mxu0 %v1930_v62  ;;  %1631 = vmatpush3.bf16.msra.mxu1 %v1937_v0 }
 0x117   : > { %1601 = vmatprep.subr.bf16.mxu0 %v1939_v1  ;;  %1633 = vmatprep.subr.bf16.mxu1 %v1951_v6 }
 0x11a   : > { %1603 = vmatpush3.bf16.msra.mxu0 %v1977_v18  ;;  %1635 = vmatpush3.bf16.msra.mxu1 %v1990_v23  ;;  %v1662_v23 = vld [vmem:[%s2241_s3 + $0xd0] sm:$0xff]  }
 0x11b   : > { %1605 = vmatprep.subr.bf16.mxu0 %v1992_v24  ;;  %1637 = vmatprep.subr.bf16.mxu1 %v2004_v31  ;;  %v1663_v24 = vld [vmem:[%s2241_s3 + $0x10] sm:$0xff]   ;;  %v1667_v31 = vld [vmem:[%s2241_s3 + $0x18] sm:$0xff]  }
 0x11e   : > { %1607 = vmatpush3.bf16.msra.mxu0 %v2021_v37  ;;  %1639 = vmatpush3.bf16.msra.mxu1 %v2031_v42  ;;  %v1672_v37 = vld [vmem:[%s2241_s3 + $0xa0] sm:$0xff]   ;;  %v1675_v42 = vld [vmem:[%s2241_s3 + $0x28] sm:$0xff]  }
 0x11f   : > { %1609 = vmatprep.subr.bf16.mxu0 %v2033_v44  ;;  %1641 = vmatprep.subr.bf16.mxu1 %v2036_v45  ;;  %v1676_v44 = vld [vmem:[%s2241_s3 + $0xa8] sm:$0xff]   ;;  %v1677_v45 = vld [vmem:[%s2241_s3 + $0x70] sm:$0xff]  }
 0x122   : > { %1611 = vmatpush3.bf16.msra.mxu0 %v1546_v46  ;;  %1643 = vmatpush3.bf16.msra.mxu1 %v1578_v47  ;;  %v1678_v46 = vld [vmem:[%s2241_s3 + $0xf0] sm:$0xff]  }
 0x123   : > { %737 = vmatprep.subr.mxu0 %v293_v53  ;;  %808 = vmatprep.subr.mxu1 %v295_v54  ;;  %v1679_v47 = vld [vmem:[%s2241_s3 + $0x30] sm:$0xff]   ;;  %v1682_v53 = vld [vmem:[%s2241_s3 + $0xf8] sm:$0xff]  }
 0x124   : > { %v1683_v54 = vld [vmem:[%s2241_s3 + $0x38] sm:$0xff]  }
 0x1d8   : > { %v507_v3 = vpop.f32.mrb[2].mxu0  ;;  %v578_v7 = vpop.f32.mrb[2].mxu1 }
 0x1d9   : > { %v2103_v8 = vsub.f32 %v2043_v48, %v507_v3  ;;  %v2106_v12 = vsub.f32 %v2046_v49, %v578_v7  ;;  %v509_v16 = vpop.f32.mrb[3].mxu0  ;;  %v580_v17 = vpop.f32.mrb[3].mxu1  ;;  %v1680_v48 = vld [vmem:[%s2241_s3 + $0xb0] sm:$0xff]   ;;  %v1681_v49 = vld [vmem:[%s2241_s3 + $0x78] sm:$0xff]  }
 0x1da   : > { %v2109_v21 = vsub.f32 %v1998_v28, %v509_v16  ;;  %v2112_v25 = vsub.f32 %v2001_v29, %v580_v17  ;;  %v1665_v28 = vld [vmem:[%s2241_s3 + $0x58] sm:$0xff]  }
 0x1db   : > { %v587_v34 = vmul.f32 %v2103_v8, %v2103_v8  ;;  %v589_v38 = vmul.f32 %v2106_v12, %v2106_v12  ;;  %v1666_v29 = vld [vmem:[%s2241_s3 + $0xd8] sm:$0xff]  }
 0x1dc   : > { %v588_v26 = vmul.f32 %v2109_v21, %v2109_v21  ;;  %v590_v30 = vmul.f32 %v2112_v25, %v2112_v25 }
 0x1de   : > { %655 = vmatprep.mubr.f32.mxu0 %v588_v26  ;;  %725 = vmatprep.mubr.f32.mxu1 %v590_v30 }
 0x1df   : > { %656 = vmatmul.mubr.f32.vlgmr.msra.gmra.mrb[4].mxu0 %v587_v34  ;;  %726 = vmatmul.mubr.f32.vlgmr.msra.gmra.mrb[4].mxu1 %v589_v38 }
 0x1e0   : > { %738 = vmatpush1.msra.mxu0 %v2059_v55  ;;  %809 = vmatpush1.msra.mxu1 %v2064_v57  ;;  %v1684_v55 = vld [vmem:[%s2241_s3 + $0xb8] sm:$0xff]  }
 0x1e1   : > { %801 = vmatprep.mubr.f32.mxu0 %v1695_v58  ;;  %872 = vmatprep.mubr.f32.mxu1 %v1695_v58 }
 0x1e2   : > { %1472 = vmatprep.subr.bf16.mxu0 %v1653_v39  ;;  %1494 = vmatprep.subr.bf16.mxu1 %v1654_v43 }
 0x2b2   : > { %v1434_v50 = vpop.f32.mrb[4].mxu0  ;;  %v1469_v51 = vpop.f32.mrb[4].mxu1 }
 0x2b3   : > { %v1435_v52 = vpop.f32.mrb[5].mxu0  ;;  %v1470_v56 = vpop.f32.mrb[5].mxu1 }
 0x2b4   : > { %v1436_v62 = vadd.f32 %v1435_v52, %v1434_v50  ;;  %v1471_v0 = vadd.f32 %v1470_v56, %v1469_v51 }
 0x2b6   : > { %v728_v1 = vadd.f32 %v1471_v0, %v1436_v62 }
 0x2b8   : > { %v731_v6 = vmul.f32 0.0078125, %v728_v1 }
 0x2ba   : > { %v732_v10 = vadd.f32 1e-05, %v731_v6 }
 0x2bc   : > { %1685 = vrsqrt.f32 %v732_v10 }
 0x2c6   : > { %v1686_v18 = vpop.eup %1685 }
 0x2c7   : > { %1294 = vmatmul.mubr.msk.f32.vlgmr.msra.gmra.mrb[6].mxu0 %vm437_vm0, %v1686_v18  ;;  %1295 = vmatmul.mubr.msk.f32.vlgmr.msra.gmra.mrb[6].mxu1 %vm437_vm0, %v1686_v18 }
 0x2c8   : > { %1473 = vmatpush3.bf16.msra.mxu0 %v1655_v11  ;;  %1495 = vmatpush3.bf16.msra.mxu1 %v1656_v13 }
 0x2c9   : > { %1474 = vmatprep.subr.bf16.mxu0 %v1657_v14  ;;  %1496 = vmatprep.subr.bf16.mxu1 %v1658_v15 }
 0x2cc   : > { %1475 = vmatpush3.bf16.msra.mxu0 %v1659_v19  ;;  %1497 = vmatpush3.bf16.msra.mxu1 %v1660_v20 }
 0x2cd   : > { %1476 = vmatprep.subr.bf16.mxu0 %v1661_v22  ;;  %1498 = vmatprep.subr.bf16.mxu1 %v1662_v23 }
 0x2d0   : > { %1477 = vmatpush3.bf16.msra.mxu0 %v1663_v24  ;;  %1499 = vmatpush3.bf16.msra.mxu1 %v1664_v27 }
 0x2d1   : > { %1478 = vmatprep.subr.bf16.mxu0 %v1665_v28  ;;  %1500 = vmatprep.subr.bf16.mxu1 %v1666_v29 }
 0x2d4   : > { %1479 = vmatpush3.bf16.msra.mxu0 %v1667_v31  ;;  %1501 = vmatpush3.bf16.msra.mxu1 %v1668_v32 }
 0x2d5   : > { %1480 = vmatprep.subr.bf16.mxu0 %v1669_v33  ;;  %1502 = vmatprep.subr.bf16.mxu1 %v1670_v35 }
 0x2d8   : > { %1481 = vmatpush3.bf16.msra.mxu0 %v1671_v36  ;;  %1503 = vmatpush3.bf16.msra.mxu1 %v1672_v37 }
 0x2d9   : > { %1482 = vmatprep.subr.bf16.mxu0 %v1673_v40  ;;  %1504 = vmatprep.subr.bf16.mxu1 %v1674_v41 }
 0x2dc   : > { %1483 = vmatpush3.bf16.msra.mxu0 %v1675_v42  ;;  %1505 = vmatpush3.bf16.msra.mxu1 %v1676_v44 }
 0x2dd   : > { %1484 = vmatprep.subr.bf16.mxu0 %v1677_v45  ;;  %1506 = vmatprep.subr.bf16.mxu1 %v1678_v46 }
 0x2e0   : > { %1485 = vmatpush3.bf16.msra.mxu0 %v1679_v47  ;;  %1507 = vmatpush3.bf16.msra.mxu1 %v1680_v48 }
 0x2e1   : > { %1486 = vmatprep.subr.bf16.mxu0 %v1681_v49  ;;  %1508 = vmatprep.subr.bf16.mxu1 %v1682_v53 }
 0x2e4   : > { %1487 = vmatpush3.bf16.msra.mxu0 %v1683_v54  ;;  %1509 = vmatpush3.bf16.msra.mxu1 %v1684_v55 }
 0x39a   : > { %v803_v57 = vpop.f32.mrb[6].mxu0  ;;  %v874_v58 = vpop.f32.mrb[6].mxu1 }
 0x39b   : > { %v879_v59 = vmul.f32 %v803_v57, %v2103_v8  ;;  %v881_v60 = vmul.f32 %v874_v58, %v2106_v12  ;;  %v805_v61 = vpop.f32.mrb[7].mxu0  ;;  %v876_v63 = vpop.f32.mrb[7].mxu1  ;;  %v1296_v8 = vld [vmem:[%s2242_s4] ss:$0 sm:$0xff] }
 0x39c   : > { %v880_v2 = vmul.f32 %v805_v61, %v2109_v21  ;;  %v882_v4 = vmul.f32 %v876_v63, %v2112_v25 }
 0x39d   : > { %v883_v3 = vpack.c.bf16 %v879_v59, %v879_v59  ;;  %v885_v7 = vpack.c.bf16 %v881_v60, %v881_v60 }
 0x39e   : > { %v884_v5 = vpack.c.bf16 %v880_v2, %v880_v2  ;;  %v886_v9 = vpack.c.bf16 %v882_v4, %v882_v4 }
 0x3a0   : > { %1182 = vmatprep.mubr.bf16.mxu0 %v884_v5  ;;  %1222 = vmatprep.mubr.bf16.mxu1 %v886_v9 }
 0x3a1   : > { %1183 = vmatmul.mubr.bf16.vlgmr.msra.gmra.mrb[8].mxu0 %v883_v3  ;;  %1223 = vmatmul.mubr.bf16.vlgmr.msra.gmra.mrb[8].mxu1 %v885_v7 }
 0x474   : > { %v1488_v16 = vpop.f32.mrb[8].mxu0  ;;  %v1510_v17 = vpop.f32.mrb[8].mxu1 }
 0x475   : > { %v1489_v12 = vpop.f32.mrb[9].mxu0  ;;  %v1511_v26 = vpop.f32.mrb[9].mxu1 }
 0x476   : > { %v1490_v21 = vadd.f32 %v1489_v12, %v1488_v16  ;;  %v1512_v30 = vadd.f32 %v1511_v26, %v1510_v17  ;;  %v1491_v25 = vpop.f32.mrb[10].mxu0  ;;  %v1513_v34 = vpop.f32.mrb[10].mxu1 }
 0x477   : > { %v1492_v38 = vpop.f32.mrb[11].mxu0  ;;  %v1514_v39 = vpop.f32.mrb[11].mxu1 }
 0x478   : > { %v1185_v43 = vadd.f32 %v1490_v21, %v1296_v8 }
 0x47a   : > { %v1225_v50 = vadd.f32 %v1512_v30, %v1185_v43 }
 0x47c   : > { %1230 = vst [vmem:[%s222_s24] sm:$0xff] %v1225_v50 }
 0x47d PF: > { %s15_s18 = sadd.s32 1, %s1693_s18  }
 0x47e   : > { %p12_p4 = scmp.ge.s32.totalorder %s15_s18, 4  }
 0x480   :  { %14 = sbr.rel (!%p12_p4) target bundleno = 1 (0x1), region = 70 }

</bundles_post_ra>
